<compile_context>
chip_gen: v7x
topology: tpu7x:2x2x1
jax: 0.10.0
libtpu: 0.0.40
codegen_flags: <defaults>
</compile_context>

<pallas_src>
import functools

import jax
import jax.numpy as jnp
from jax.experimental import pallas as pl
from jax.experimental.pallas import tpu as pltpu


def _round_up(x, m):
    return ((x + m - 1) // m) * m


def _vmem_usable_bytes():
    """~85% of this core's physical VMEM (conservative 64 MiB fallback)."""
    cap = 64 << 20
    try:
        info = pltpu.get_tpu_info()
        cap = int(getattr(info, "vmem_capacity_bytes", cap))
    except Exception:
        pass
    return int(cap * 0.85)


# ---------------------------------------------------------------------------
# Kernels
# ---------------------------------------------------------------------------
def _patch_embed_kernel_bias(x_ref, w_ref, b_ref, o_ref):
    # x_ref: (TM, K), w_ref: (K, Ep), b_ref: (1, Ep), o_ref: (TM, Ep)
    acc = jnp.dot(x_ref[...], w_ref[...], preferred_element_type=jnp.float32)
    o_ref[...] = (acc + b_ref[...].astype(jnp.float32)).astype(o_ref.dtype)


def _patch_embed_kernel_nobias(x_ref, w_ref, o_ref):
    acc = jnp.dot(x_ref[...], w_ref[...], preferred_element_type=jnp.float32)
    o_ref[...] = acc.astype(o_ref.dtype)


# ---------------------------------------------------------------------------
# pallas_call wrapper
# ---------------------------------------------------------------------------
@functools.partial(jax.jit, static_argnames=("tile_m", "out_dtype"))
def patch_embed_pallas(x2d, w2d, b2d, *, tile_m=512, out_dtype=jnp.float32):
    """out[M, Ep] = x2d[M, K] @ w2d[K, Ep] (+ b2d[1, Ep])."""
    M, K = x2d.shape
    Kw, Ep = w2d.shape
    assert K == Kw, (K, Kw)

    x_isz = x2d.dtype.itemsize
    w_isz = w2d.dtype.itemsize
    o_isz = jnp.dtype(out_dtype).itemsize

    # --- pick the token tile ----------------------------------------------
    if M <= tile_m:
        tm = M  # single full-extent block (ok even if not a multiple of 8)
    else:
        tm = tile_m
        # Keep >= 4 grid steps: pipeline depth + both TensorCores on v7x.
        while tm > 256 and pl.cdiv(M, tm) < 4:
            tm //= 2

    def vmem_need(t):
        return (2 * t * K * x_isz            # double-buffered x tile
                + 2 * t * Ep * o_isz         # double-buffered out tile
                + 2 * (K * Ep + Ep) * w_isz  # resident weight / bias buffers
                + t * Ep * 4)                # f32 matmul intermediate

    usable = _vmem_usable_bytes()
    # Auto-shrink tm instead of compiling with an impossible VMEM request.
    while tm < M and tm > 64 and vmem_need(tm) + (8 << 20) > usable:
        tm //= 2                              # stays a multiple of 8

    grid = (pl.cdiv(M, tm),)
    vmem_limit = int(min(max(vmem_need(tm) + (8 << 20), 32 << 20), usable))

    in_specs = [
        pl.BlockSpec((tm, K), lambda i: (i, 0)),   # stream M tiles of x
        pl.BlockSpec((K, Ep), lambda i: (0, 0)),   # weight DMA'd once, resident
    ]
    args = [x2d, w2d]
    if b2d is not None:
        in_specs.append(pl.BlockSpec((1, Ep), lambda i: (0, 0)))
        args.append(b2d)
        kernel = _patch_embed_kernel_bias
    else:
        kernel = _patch_embed_kernel_nobias

    cost = pl.CostEstimate(
        flops=2 * M * K * Ep,
        transcendentals=0,
        bytes_accessed=(M * K * x_isz + K * Ep * w_isz
                        + M * Ep * o_isz + Ep * 4),
    )

    return pl.pallas_call(
        kernel,
        out_shape=jax.ShapeDtypeStruct((M, Ep), out_dtype),
        grid_spec=pltpu.PrefetchScalarGridSpec(
            num_scalar_prefetch=0,
            grid=grid,
            in_specs=in_specs,
            out_specs=pl.BlockSpec((tm, Ep), lambda i: (i, 0)),
        ),
        compiler_params=pltpu.CompilerParams(
            dimension_semantics=("parallel",),   # shard M across TCs on v7x
            vmem_limit_bytes=vmem_limit,
        ),
        cost_estimate=cost,
    )(*args)


# ---------------------------------------------------------------------------
# Module wrapper
# ---------------------------------------------------------------------------
class PatchEmbeddingPallas:
    """JAX/Pallas re-implementation of the PyTorch TCL PatchEmbedding."""

    def __init__(self, input_size, patch_size, embed_dim, bias=True,
                 device=None, ignore_modes=(0, 1, 2), key=None,
                 tile_m=512, compute_dtype=jnp.bfloat16):
        del device, ignore_modes  # API parity with the PyTorch module
        self.input_size = input_size
        self.patch_size = patch_size
        self.embed_dim = embed_dim
        self.use_bias = bias
        self.tile_m = tile_m
        self.compute_dtype = compute_dtype

        B, C, H, W = input_size
        assert H % patch_size == 0 and W % patch_size == 0
        self.p1 = H // patch_size
        self.p2 = W // patch_size

        K = patch_size * patch_size * C
        self.K = K
        self.e_pad = _round_up(embed_dim, 128)   # lane-dense output stores

        if key is None:
            key = jax.random.PRNGKey(0)
        k_w, k_b = jax.random.split(key)
        scale = 1.0 / jnp.sqrt(jnp.float32(K))
        # TCL factor: (embed_dim, h, w, c); deterministic init.
        self.weight = (jax.random.normal(
            k_w, (embed_dim, patch_size, patch_size, C), dtype=jnp.float32)
            * scale)
        self.bias = (jax.random.normal(k_b, (embed_dim,), dtype=jnp.float32)
                     * scale) if bias else None

        # Pre-transpose / pre-pad the weight ONCE: (E, h, w, c) -> (K, Ep).
        w2d = self.weight.reshape(embed_dim, K).T                 # (K, E)
        w2d = jnp.pad(w2d, ((0, 0), (0, self.e_pad - embed_dim)))  # lane pad
        if compute_dtype is not None:
            w2d = w2d.astype(compute_dtype)
        self.w2d = w2d

        if bias:
            b2d = self.bias.reshape(1, embed_dim)
            self.b2d = jnp.pad(b2d, ((0, 0), (0, self.e_pad - embed_dim)))
        else:
            self.b2d = None

    def __call__(self, x):
        B, C, H, W = x.shape
        p, p1, p2 = self.patch_size, self.p1, self.p2
        E, Ep, K = self.embed_dim, self.e_pad, self.K

        if self.compute_dtype is not None:
            x = x.astype(self.compute_dtype)

        # rearrange 'b c (p1 h) (p2 w) -> b p1 p2 h w c' as a single XLA
        # transpose (+ fused bf16 cast) pass.
        # TODO(synk): fuse this NCHW->patch rearrange into the kernel to
        # remove the remaining extra HBM pass over the activations.
        x = x.reshape(B, C, p1, p, p2, p)
        x = jnp.transpose(x, (0, 2, 4, 3, 5, 1))   # (B, p1, p2, h, w, c)
        x2d = x.reshape(B * p1 * p2, K)            # no M / K padding copies

        out2d = patch_embed_pallas(x2d, self.w2d,
                                   self.b2d if self.use_bias else None,
                                   tile_m=self.tile_m, out_dtype=jnp.float32)
        if Ep != E:
            out2d = out2d[:, :E]
        return out2d.reshape(B, p1, p2, E)


if __name__ == "__main__":
    key = jax.random.PRNGKey(0)
    k_x, k_p = jax.random.split(key)

    B, C, H, W = 2, 4, 16, 16
    patch_size = 4
    embed_dim = 32

    x = jax.random.normal(k_x, (B, C, H, W), dtype=jnp.float32)

    module = PatchEmbeddingPallas(
        input_size=(B, C, H, W),
        patch_size=patch_size,
        embed_dim=embed_dim,
        bias=True,
        key=k_p,
    )

    out = jax.block_until_ready(module(x))
    assert out.shape == (B, H // patch_size, W // patch_size, embed_dim)

    # Reference (plain JAX) with the same bf16 rounding of streamed operands.
    xr = x.reshape(B, C, H // patch_size, patch_size, W // patch_size, patch_size)
    xr = jnp.transpose(xr, (0, 2, 4, 3, 5, 1))     # (B, p1, p2, h, w, c)
    xr = xr.astype(jnp.bfloat16).astype(jnp.float32)
    wr = module.weight.astype(jnp.bfloat16).astype(jnp.float32)
    ref = jnp.einsum("bpqhwc,ehwc->bpqe", xr, wr,
                     precision=jax.lax.Precision.HIGHEST) + module.bias
    err = float(jnp.max(jnp.abs(out - ref)))
    assert jnp.allclose(out, ref, atol=2e-2, rtol=2e-2), err

    print("KERNEL_OK")
</pallas_src>

<mosaic_0001>
module attributes {stable_mosaic.version = 11 : i64} {
  func.func @_patch_embed_kernel_bias(%arg0: i32, %arg1: memref<32x64xbf16, #tpu.memory_space<vmem>>, %arg2: memref<64x128xbf16, #tpu.memory_space<vmem>>, %arg3: memref<1x128xf32, #tpu.memory_space<vmem>>, %arg4: memref<32x128xf32, #tpu.memory_space<vmem>>) attributes {dimension_semantics = [#tpu.dimension_semantics<parallel>], iteration_bounds = array<i64: 1>, scalar_prefetch = 0 : i64, scratch_operands = 0 : i64, tpu.core_type = #tpu.core_type<tc>, window_params = [{transform_indices = @transform_0, window_bounds = array<i64: 32, 64>}, {pipeline_mode = #tpu.pipeline_mode<synchronous>, transform_indices = @transform_1, window_bounds = array<i64: 64, 128>}, {pipeline_mode = #tpu.pipeline_mode<synchronous>, transform_indices = @transform_2, window_bounds = array<i64: 1, 128>}, {transform_indices = @transform_3, window_bounds = array<i64: 32, 128>}]} {
    %c0 = arith.constant 0 : index
    %c0_0 = arith.constant 0 : index
    %0 = vector.load %arg1[%c0, %c0_0] : memref<32x64xbf16, #tpu.memory_space<vmem>>, vector<32x64xbf16>
    %c0_1 = arith.constant 0 : index
    %c0_2 = arith.constant 0 : index
    %1 = vector.load %arg2[%c0_1, %c0_2] : memref<64x128xbf16, #tpu.memory_space<vmem>>, vector<64x128xbf16>
    %cst = arith.constant dense<0.000000e+00> : vector<32x128xf32>
    %2 = tpu.matmul %0, %1, %cst {dimension_numbers = #tpu.dot_dimension_numbers<[1], [0], [0], [1], [0, 0, 1, 1], [], []>} : vector<32x64xbf16>, vector<64x128xbf16>, vector<32x128xf32> -> vector<32x128xf32>
    %c0_3 = arith.constant 0 : index
    %c0_4 = arith.constant 0 : index
    %3 = vector.load %arg3[%c0_3, %c0_4] : memref<1x128xf32, #tpu.memory_space<vmem>>, vector<1x128xf32>
    %4 = vector.broadcast %3 : vector<1x128xf32> to vector<32x128xf32>
    %5 = arith.addf %2, %4 : vector<32x128xf32>
    %c0_5 = arith.constant 0 : index
    %c0_6 = arith.constant 0 : index
    %6 = vector.load %arg4[%c0_5, %c0_6] : memref<32x128xf32, #tpu.memory_space<vmem>>, vector<32x128xf32>
    tpu.vector_store %arg4[%c0_5, %c0_6], %5 {strides = array<i32>} : memref<32x128xf32, #tpu.memory_space<vmem>>, vector<32x128xf32>,
    return
  }
  func.func @transform_0(%arg0: i32) -> (i32, i32) {
    %c0_i32 = arith.constant 0 : i32
    %c0_i32_0 = arith.constant 0 : i32
    return %arg0, %c0_i32 : i32, i32
  }
  func.func @transform_1(%arg0: i32) -> (i32, i32) {
    %c0_i32 = arith.constant 0 : i32
    %c0_i32_0 = arith.constant 0 : i32
    %c0_i32_1 = arith.constant 0 : i32
    return %c0_i32, %c0_i32_0 : i32, i32
  }
  func.func @transform_2(%arg0: i32) -> (i32, i32) {
    %c0_i32 = arith.constant 0 : i32
    %c0_i32_0 = arith.constant 0 : i32
    %c0_i32_1 = arith.constant 0 : i32
    return %c0_i32, %c0_i32_0 : i32, i32
  }
  func.func @transform_3(%arg0: i32) -> (i32, i32) {
    %c0_i32 = arith.constant 0 : i32
    %c0_i32_0 = arith.constant 0 : i32
    return %arg0, %c0_i32 : i32, i32
  }
}

</mosaic_0001>

<bundles_post_ra>
// kernel: patch_embed_pallas.1
= control target key start
LH: loop header
LB: loop body
LE: loop exit
PB: predicated region body
PF: predicated region fallthrough
CT: control target
= control target key end

     0   :  { %8 = vsyncpa [#allocation3], 0  ;;  %s353_s0 = inlined_call_operand.hbm [shape: bf16[32,64], index: 0, kind: input, shape index: {}]   ;;  %s354_s1 = inlined_call_operand.hbm [shape: bf16[64,128], index: 1, kind: input, shape index: {}]   ;;  %s355_s2 = inlined_call_operand.vmem [shape: f32[1,128], index: 2, kind: input, shape index: {}]   ;;  %s356_s3 = inlined_call_operand.hbm [shape: f32[32,128], index: 3, kind: output, shape index: {}]  }
   0x1   :  { %9 = vsyncpa [#allocation6], 0 }
   0x2   :  { %10 = vsyncpa [#allocation4], 0  ;;  %s287_s12 = smov [#allocation2]   ;;  %s215_s16 = scalar_lea.hbm %s353_s0, 256 }
   0x3   :  { %s16_s13 = sshll.u32 %s287_s12, 4  ;;  %p216_p0 = scmp.ne.s32.totalorder %s353_s0, %s215_s16  ;;  %s17_s13 = int_to_ptr.vmem [resolvable:$true] %s16_s13 }
   0x4   :  { %p219_p1 = scmp.lt.u32.totalorder %s215_s16, %s353_s0 }
   0x6   :  { %p221_p2 = pnand %p219_p1, %p216_p0 }
   0x8   :  { %224 = shalt.err (!%p221_p2)
}
   0x9   :  { %s225_s21 = scalar_lea.vmem %s17_s13, 256  ;;  %p230_p4 = scmp.lt.s32.totalorder %s17_s13, %s17_s13 }
   0xa   :  { %p226_p3 = scmp.ne.s32.totalorder %s17_s13, %s225_s21  ;;  %p231_p5 = scmp.lt.s32.totalorder %s225_s21, %s225_s21 }
   0xc   :  { %p232_p6 = por %p231_p5, %p230_p4 }
   0xe   :  { %p233_p7 = pnand %p232_p6, %p226_p3 }
  0x10   :  { %236 = shalt.err (!%p233_p7)
}
  0x11   :  { %s288_s22 = smov 64   ;;  %s289_s23 = smov 4  }
  0x12   :  { %22 = dma.hbm_to_vmem [thread:$0]  %s353_s0, 256, %s17_s13, [#allocation3], %s288_s22, %s288_s22, %s289_s23  }
  0x13   :  { %s290_s26 = smov [#allocation5]   ;;  %s237_s30 = scalar_lea.hbm %s354_s1, 512 }
  0x14   :  { %s28_s27 = sshll.u32 %s290_s26, 4  ;;  %p238_p8 = scmp.ne.s32.totalorder %s354_s1, %s237_s30  ;;  %s29_s27 = int_to_ptr.vmem [resolvable:$true] %s28_s27 }
  0x15   :  { %p241_p9 = scmp.lt.u32.totalorder %s237_s30, %s354_s1 }
  0x17   :  { %p243_p10 = pnand %p241_p9, %p238_p8 }
  0x19   :  { %246 = shalt.err (!%p243_p10)
}
  0x1a   :  { %s247_s8 = scalar_lea.vmem %s29_s27, 512  ;;  %p252_p12 = scmp.lt.s32.totalorder %s29_s27, %s29_s27 }
  0x1b   :  { %p248_p11 = scmp.ne.s32.totalorder %s29_s27, %s247_s8  ;;  %p253_p13 = scmp.lt.s32.totalorder %s247_s8, %s247_s8 }
  0x1d   :  { %p254_p0 = por %p253_p13, %p252_p12 }
  0x1f   :  { %p255_p1 = pnand %p254_p0, %p248_p11 }
  0x21   :  { %258 = shalt.err (!%p255_p1)
}
  0x22   :  { %34 = dma.hbm_to_vmem [thread:$0]  %s354_s1, 512, %s29_s27, [#allocation6], %s288_s22, %s288_s22, %s289_s23  }
  0x23   :  { %281 = dma.done.wait [#allocation3], 256  }
  0x24   :  { %282 = vsyncadd [#allocation3], 4294967040 }
  0x25   :  { %283 = dma.done.wait [#allocation6], 512  }
  0x26   :  { %284 = vsyncadd [#allocation6], 4294966784  ;;  %v209_v0 = vld [vmem:[#allocation5] sm:$0xff]   ;;  %v210_v1 = vld [vmem:[#allocation5 + $0x8] sm:$0xff]   ;;  %vm97_vm0 = vcmask 523264   ;;  %s291_s11 = smov [#allocation7]  }
  0x27   :  { %190 = vmatprep.subr.bf16.mxu0 %v209_v0  ;;  %v211_v2 = vld [vmem:[#allocation5 + $0x10] sm:$0xff]   ;;  %v212_v4 = vld [vmem:[#allocation5 + $0x18] sm:$0xff]   ;;  %s162_s12 = sshll.u32 %s291_s11, 4  ;;  %s163_s12 = int_to_ptr.vmem [resolvable:$true] %s162_s12 }
  0x28   :  { %191 = vmatpush3.bf16.msra.mxu0 %v209_v0  ;;  %v213_v3 = vld [vmem:[#allocation2] sm:$0xff]   ;;  %v214_v5 = vld [vmem:[#allocation2 + $0x8] sm:$0xff]   ;;  %s259_s13 = scalar_lea.vmem %s163_s12, 512  ;;  %p264_p3 = scmp.lt.s32.totalorder %s163_s12, %s163_s12 }
  0x29   :  { %192 = vmatprep.subr.bf16.mxu0 %v210_v1  ;;  %198 = vmatprep.mubr.msk.bf16.mxu0 %vm97_vm0, %v213_v3  ;;  %v175_v6 = vld [vmem:[%s355_s2] ss:$0 sm:$0xff]  ;;  %p260_p2 = scmp.ne.s32.totalorder %s163_s12, %s259_s13  ;;  %p265_p4 = scmp.lt.s32.totalorder %s259_s13, %s259_s13 }
  0x2b   :  { %p266_p5 = por %p265_p4, %p264_p3 }
  0x2c   :  { %193 = vmatpush3.bf16.msra.mxu0 %v210_v1 }
  0x2d   :  { %194 = vmatprep.subr.bf16.mxu0 %v211_v2  ;;  %p267_p6 = pnand %p266_p5, %p260_p2 }
  0x30   :  { %195 = vmatpush3.bf16.msra.mxu0 %v211_v2 }
  0x31   :  { %196 = vmatprep.subr.bf16.mxu0 %v212_v4 }
  0x34   :  { %197 = vmatpush3.bf16.msra.mxu0 %v212_v4 }
  0x37   :  { %199 = vmatmul.mubr.msk.bf16.vlgmr.msra.gmra.mrb[0].mxu0 %vm97_vm0, %v214_v5 }
 0x10a   :  { %v200_v7 = vpop.f32.mrb[0].mxu0 }
 0x10b   :  { %v147_v8 = vadd.f32 %v200_v7, %v175_v6  ;;  %v138_v9 = vpop.f32.mrb[1].mxu0 }
 0x10c   :  { %v139_v10 = vadd.f32 %v175_v6, %v138_v9  ;;  %v201_v11 = vpop.f32.mrb[2].mxu0 }
 0x10d   :  { %155 = vst [vmem:[#allocation7 + $0x10] sm:$0xff] %v147_v8  ;;  %v150_v12 = vadd.f32 %v201_v11, %v175_v6  ;;  %v141_v13 = vpop.f32.mrb[3].mxu0 }
 0x10e   :  { %153 = vst [vmem:[#allocation7] sm:$0xff] %v139_v10  ;;  %v142_v14 = vadd.f32 %v175_v6, %v141_v13 }
 0x10f   :  { %156 = vst [vmem:[#allocation7 + $0x18] sm:$0xff] %v150_v12 }
 0x110   :  { %154 = vst [vmem:[#allocation7 + $0x8] sm:$0xff] %v142_v14 }
 0x111   :  { %270 = shalt.err (!%p267_p6)
}
 0x112   :  { %s271_s15 = scalar_lea.hbm %s356_s3, 512 }
 0x113   :  { %p272_p7 = scmp.ne.s32.totalorder %s356_s3, %s271_s15  ;;  %p275_p8 = scmp.lt.u32.totalorder %s271_s15, %s356_s3 }
 0x115   :  { %p277_p9 = pnand %p275_p8, %p272_p7 }
 0x117   :  { %280 = shalt.err (!%p277_p9)
}
 0x118   :  { %s292_s20 = smov 128   ;;  %s293_s21 = smov 8  }
 0x119   :  { %168 = dma.vmem_to_hbm [thread:$0]  %s163_s12, 512, %s356_s3, [#allocation4], %s292_s20, %s292_s20, %s293_s21  }
 0x11a   :  { %285 = dma.done.wait [#allocation4], 512  }
 0x11b   :  { %286 = vsyncadd [#allocation4], 4294966784 }
 0x11c   :  { %172 = vsyncpa [#allocation3], 1 }
 0x11d   :  { %173 = vsyncpa [#allocation6], 1 }
 0x11e   :  { %174 = vsyncpa [#allocation4], 1 }

</bundles_post_ra>
